<compile_context>
chip_gen: v5e
topology: v5e:2x2
jax: 0.10.0
libtpu: 0.0.40
codegen_flags: <defaults>
</compile_context>

<pallas_src>
import functools

import jax
import jax.numpy as jnp
from jax.experimental import pallas as pl
from jax.experimental.pallas import tpu as pltpu


HIDDEN = 64


def critic_kernel(x_ref, w1_ref, b1_ref, w2_ref, b2_ref, w3_ref, b3_ref, o_ref):
    # x: (TB, state_dim)  w1: (state_dim, 64)  w2: (64, 64)  w3: (1, 64) row
    x = x_ref[...]
    h1 = jnp.tanh(
        jnp.dot(x, w1_ref[...], preferred_element_type=jnp.float32) + b1_ref[...]
    )
    h2 = jnp.tanh(
        jnp.dot(h1, w2_ref[...], preferred_element_type=jnp.float32) + b2_ref[...]
    )
    # Linear(64, 1) as VPU multiply + lane reduce; store only the real column.
    out = jnp.sum(h2 * w3_ref[...], axis=-1, keepdims=True) + b3_ref[...]
    o_ref[...] = out.astype(o_ref.dtype)


def _round_up(x, m):
    return ((x + m - 1) // m) * m


def _lane_pad(n):
    return _round_up(max(int(n), 1), 128)


def _vmem_estimate_bytes(tile, state_dim):
    # Double-buffered input and output blocks (VMEM lane-pads the last dim to
    # 128 even for the logical width-1 output), plus f32 h1/h2 temporaries.
    in_bytes = 2 * tile * _lane_pad(state_dim) * 4
    out_bytes = 2 * tile * 128 * 4
    tmp_bytes = 2 * tile * 128 * 4
    return in_bytes + out_bytes + tmp_bytes


_VMEM_BUDGET = 12 << 20  # conservative vs v5e's 16 MiB default scoped VMEM


def _pick_tile(batch, state_dim, batch_tile):
    batch_tile = max(8, _round_up(int(batch_tile), 8))
    if batch <= 64:
        # Tiny RL-inference batch: one grid step, block shape == full array dims.
        return batch
    # Always >= 2 grid steps so the "parallel" batch axis can shard across both
    # TensorCores on v7x; tile stays a multiple of 8 for (8,128) legality.
    tile = min(batch_tile, _round_up(pl.cdiv(batch, 2), 8))
    while tile > 256 and _vmem_estimate_bytes(tile, state_dim) > _VMEM_BUDGET:
        tile = max(256, _round_up(tile // 2, 8))
    return tile


@functools.partial(jax.jit, static_argnames=("batch_tile",))
def critic_forward(x, params, batch_tile=2048):
    w1, b1, w2, b2, w3, b3 = params
    batch, state_dim = x.shape

    w3_row = w3.reshape(1, HIDDEN)  # (64, 1) -> (1, 64) row vector (tiny, fused)
    b3_s = b3.reshape(1, 1)

    tile = _pick_tile(batch, state_dim, batch_tile)
    grid = (pl.cdiv(batch, tile),)

    def resident(shape):
        # Same full block every grid step -> stays resident in VMEM.
        return pl.BlockSpec(shape, lambda i: (0, 0))

    return pl.pallas_call(
        critic_kernel,
        out_shape=jax.ShapeDtypeStruct((batch, 1), jnp.float32),
        grid_spec=pl.GridSpec(
            grid=grid,
            in_specs=[
                pl.BlockSpec((tile, state_dim), lambda i: (i, 0)),
                resident(w1.shape),
                resident(b1.shape),
                resident(w2.shape),
                resident(b2.shape),
                resident(w3_row.shape),
                resident(b3_s.shape),
            ],
            out_specs=pl.BlockSpec((tile, 1), lambda i: (i, 0)),
        ),
        compiler_params=pltpu.CompilerParams(
            dimension_semantics=("parallel",),
        ),
    )(x, w1, b1, w2, b2, w3_row, b3_s)


def init_critic_params(key, state_dim):
    """Deterministic init mimicking PyTorch nn.Linear default (uniform +-1/sqrt(fan_in)).

    Weights are stored as [in, out] (transposed relative to torch's [out, in]).
    """

    def linear_init(k, fan_in, fan_out):
        kw, kb = jax.random.split(k)
        bound = 1.0 / jnp.sqrt(jnp.asarray(fan_in, jnp.float32))
        w = jax.random.uniform(kw, (fan_in, fan_out), jnp.float32, -bound, bound)
        b = jax.random.uniform(kb, (1, fan_out), jnp.float32, -bound, bound)
        return w, b

    k1, k2, k3 = jax.random.split(key, 3)
    w1, b1 = linear_init(k1, state_dim, HIDDEN)
    w2, b2 = linear_init(k2, HIDDEN, HIDDEN)
    w3, b3 = linear_init(k3, HIDDEN, 1)
    return (w1, b1, w2, b2, w3, b3)


def critic_reference(x, params):
    w1, b1, w2, b2, w3, b3 = params
    h1 = jnp.tanh(x @ w1 + b1)
    h2 = jnp.tanh(h1 @ w2 + b2)
    return h2 @ w3 + b3


def _check(out, ref):
    # Loose-ish tolerance: default-precision f32 matmuls may use a different
    # number of bf16 MXU passes in the Mosaic vs. XLA lowerings (~1e-3 level);
    # structural bugs would produce O(0.1) errors and still be caught.
    assert jnp.allclose(out, ref, atol=1e-2, rtol=1e-3), float(
        jnp.max(jnp.abs(out - ref))
    )


if __name__ == "__main__":
    key = jax.random.PRNGKey(0)
    k_params, k_x1, k_x2, k_x3 = jax.random.split(key, 4)

    state_dim = 4
    params = init_critic_params(k_params, state_dim)

    # Small-batch path (single grid step, everything resident in VMEM).
    x_small = jax.random.normal(k_x1, (8, state_dim), jnp.float32)
    out_small = jax.block_until_ready(critic_forward(x_small, params))
    assert out_small.shape == (8, 1), out_small.shape
    _check(out_small, critic_reference(x_small, params))

    # Mid-size batch: forced >= 2 grid steps (dual-TC split on v7x), ragged tail.
    x_mid = jax.random.normal(k_x2, (200, state_dim), jnp.float32)
    out_mid = jax.block_until_ready(critic_forward(x_mid, params))
    assert out_mid.shape == (200, 1), out_mid.shape
    _check(out_mid, critic_reference(x_mid, params))

    # Large batch: tile capped at batch_tile, multiple grid steps, ragged tail.
    x_big = jax.random.normal(k_x3, (5000, state_dim), jnp.float32)
    out_big = jax.block_until_ready(critic_forward(x_big, params))
    assert out_big.shape == (5000, 1), out_big.shape
    _check(out_big, critic_reference(x_big, params))

    print("KERNEL_OK")
</pallas_src>

<mosaic_0001>
module attributes {stable_mosaic.version = 11 : i64} {
  func.func @critic_kernel(%arg0: i32, %arg1: memref<8x4xf32, #tpu.memory_space<vmem>>, %arg2: memref<4x64xf32, #tpu.memory_space<vmem>>, %arg3: memref<1x64xf32, #tpu.memory_space<vmem>>, %arg4: memref<64x64xf32, #tpu.memory_space<vmem>>, %arg5: memref<1x64xf32, #tpu.memory_space<vmem>>, %arg6: memref<1x64xf32, #tpu.memory_space<vmem>>, %arg7: memref<1x1xf32, #tpu.memory_space<vmem>>, %arg8: memref<8x1xf32, #tpu.memory_space<vmem>>) attributes {dimension_semantics = [#tpu.dimension_semantics<parallel>], iteration_bounds = array<i64: 1>, scalar_prefetch = 0 : i64, scratch_operands = 0 : i64, tpu.core_type = #tpu.core_type<tc>, window_params = [{transform_indices = @transform_0, window_bounds = array<i64: 8, 4>}, {pipeline_mode = #tpu.pipeline_mode<synchronous>, transform_indices = @transform_1, window_bounds = array<i64: 4, 64>}, {pipeline_mode = #tpu.pipeline_mode<synchronous>, transform_indices = @transform_2, window_bounds = array<i64: 1, 64>}, {pipeline_mode = #tpu.pipeline_mode<synchronous>, transform_indices = @transform_3, window_bounds = array<i64: 64, 64>}, {pipeline_mode = #tpu.pipeline_mode<synchronous>, transform_indices = @transform_4, window_bounds = array<i64: 1, 64>}, {pipeline_mode = #tpu.pipeline_mode<synchronous>, transform_indices = @transform_5, window_bounds = array<i64: 1, 64>}, {pipeline_mode = #tpu.pipeline_mode<synchronous>, transform_indices = @transform_6, window_bounds = array<i64: 1, 1>}, {transform_indices = @transform_7, window_bounds = array<i64: 8, 1>}]} {
    %c0 = arith.constant 0 : index
    %c0_0 = arith.constant 0 : index
    %0 = vector.load %arg1[%c0, %c0_0] : memref<8x4xf32, #tpu.memory_space<vmem>>, vector<8x4xf32>
    %c0_1 = arith.constant 0 : index
    %c0_2 = arith.constant 0 : index
    %1 = vector.load %arg2[%c0_1, %c0_2] : memref<4x64xf32, #tpu.memory_space<vmem>>, vector<4x64xf32>
    %cst = arith.constant dense<0.000000e+00> : vector<8x64xf32>
    %2 = tpu.matmul %0, %1, %cst {dimension_numbers = #tpu.dot_dimension_numbers<[1], [0], [0], [1], [0, 0, 1, 1], [], []>} : vector<8x4xf32>, vector<4x64xf32>, vector<8x64xf32> -> vector<8x64xf32>
    %c0_3 = arith.constant 0 : index
    %c0_4 = arith.constant 0 : index
    %3 = vector.load %arg3[%c0_3, %c0_4] : memref<1x64xf32, #tpu.memory_space<vmem>>, vector<1x64xf32>
    %4 = vector.broadcast %3 : vector<1x64xf32> to vector<8x64xf32>
    %5 = arith.addf %2, %4 : vector<8x64xf32>
    %6 = math.tanh %5 : vector<8x64xf32>
    %c0_5 = arith.constant 0 : index
    %c0_6 = arith.constant 0 : index
    %7 = vector.load %arg4[%c0_5, %c0_6] : memref<64x64xf32, #tpu.memory_space<vmem>>, vector<64x64xf32>
    %cst_7 = arith.constant dense<0.000000e+00> : vector<8x64xf32>
    %8 = tpu.matmul %6, %7, %cst_7 {dimension_numbers = #tpu.dot_dimension_numbers<[1], [0], [0], [1], [0, 0, 1, 1], [], []>} : vector<8x64xf32>, vector<64x64xf32>, vector<8x64xf32> -> vector<8x64xf32>
    %c0_8 = arith.constant 0 : index
    %c0_9 = arith.constant 0 : index
    %9 = vector.load %arg5[%c0_8, %c0_9] : memref<1x64xf32, #tpu.memory_space<vmem>>, vector<1x64xf32>
    %10 = vector.broadcast %9 : vector<1x64xf32> to vector<8x64xf32>
    %11 = arith.addf %8, %10 : vector<8x64xf32>
    %12 = math.tanh %11 : vector<8x64xf32>
    %c0_10 = arith.constant 0 : index
    %c0_11 = arith.constant 0 : index
    %13 = vector.load %arg6[%c0_10, %c0_11] : memref<1x64xf32, #tpu.memory_space<vmem>>, vector<1x64xf32>
    %14 = vector.broadcast %13 : vector<1x64xf32> to vector<8x64xf32>
    %15 = arith.mulf %12, %14 : vector<8x64xf32>
    %cst_12 = arith.constant dense<0.000000e+00> : vector<8xf32>
    %16 = vector.multi_reduction <add>, %15, %cst_12 [1] : vector<8x64xf32> to vector<8xf32>
    %17 = vector.shape_cast %16 : vector<8xf32> to vector<8x1xf32>
    %c0_13 = arith.constant 0 : index
    %c0_14 = arith.constant 0 : index
    %18 = vector.load %arg7[%c0_13, %c0_14] : memref<1x1xf32, #tpu.memory_space<vmem>>, vector<1x1xf32>
    %19 = vector.broadcast %18 : vector<1x1xf32> to vector<8x1xf32>
    %20 = arith.addf %17, %19 : vector<8x1xf32>
    %c0_15 = arith.constant 0 : index
    %c0_16 = arith.constant 0 : index
    %21 = vector.load %arg8[%c0_15, %c0_16] : memref<8x1xf32, #tpu.memory_space<vmem>>, vector<8x1xf32>
    tpu.vector_store %arg8[%c0_15, %c0_16], %20 {strides = array<i32>} : memref<8x1xf32, #tpu.memory_space<vmem>>, vector<8x1xf32>,
    return
  }
  func.func @transform_0(%arg0: i32) -> (i32, i32) {
    %c0_i32 = arith.constant 0 : i32
    %c0_i32_0 = arith.constant 0 : i32
    return %arg0, %c0_i32 : i32, i32
  }
  func.func @transform_1(%arg0: i32) -> (i32, i32) {
    %c0_i32 = arith.constant 0 : i32
    %c0_i32_0 = arith.constant 0 : i32
    %c0_i32_1 = arith.constant 0 : i32
    return %c0_i32, %c0_i32_0 : i32, i32
  }
  func.func @transform_2(%arg0: i32) -> (i32, i32) {
    %c0_i32 = arith.constant 0 : i32
    %c0_i32_0 = arith.constant 0 : i32
    %c0_i32_1 = arith.constant 0 : i32
    return %c0_i32, %c0_i32_0 : i32, i32
  }
  func.func @transform_3(%arg0: i32) -> (i32, i32) {
    %c0_i32 = arith.constant 0 : i32
    %c0_i32_0 = arith.constant 0 : i32
    %c0_i32_1 = arith.constant 0 : i32
    return %c0_i32, %c0_i32_0 : i32, i32
  }
  func.func @transform_4(%arg0: i32) -> (i32, i32) {
    %c0_i32 = arith.constant 0 : i32
    %c0_i32_0 = arith.constant 0 : i32
    %c0_i32_1 = arith.constant 0 : i32
    return %c0_i32, %c0_i32_0 : i32, i32
  }
  func.func @transform_5(%arg0: i32) -> (i32, i32) {
    %c0_i32 = arith.constant 0 : i32
    %c0_i32_0 = arith.constant 0 : i32
    %c0_i32_1 = arith.constant 0 : i32
    return %c0_i32, %c0_i32_0 : i32, i32
  }
  func.func @transform_6(%arg0: i32) -> (i32, i32) {
    %c0_i32 = arith.constant 0 : i32
    %c0_i32_0 = arith.constant 0 : i32
    %c0_i32_1 = arith.constant 0 : i32
    return %c0_i32, %c0_i32_0 : i32, i32
  }
  func.func @transform_7(%arg0: i32) -> (i32, i32) {
    %c0_i32 = arith.constant 0 : i32
    %c0_i32_0 = arith.constant 0 : i32
    return %arg0, %c0_i32 : i32, i32
  }
}

</mosaic_0001>

<bundles_post_ra>
// kernel: critic_forward.1
= control target key start
LH: loop header
LB: loop body
LE: loop exit
PB: predicated region body
PF: predicated region fallthrough
CT: control target
= control target key end

     0   :  { %s243_s0 = inlined_call_operand.vmem [shape: f32[8,4], index: 0, kind: input, shape index: {}]   ;;  %s244_s1 = inlined_call_operand.vmem [shape: f32[4,64], index: 1, kind: input, shape index: {}]   ;;  %s245_s2 = inlined_call_operand.vmem [shape: f32[1,64], index: 2, kind: input, shape index: {}]   ;;  %s246_s3 = inlined_call_operand.hbm [shape: f32[64,64], index: 3, kind: input, shape index: {}]   ;;  %s247_s4 = inlined_call_operand.vmem [shape: f32[1,64], index: 4, kind: input, shape index: {}]   ;;  %s248_s5 = inlined_call_operand.vmem [shape: f32[1,64], index: 5, kind: input, shape index: {}]   ;;  %s249_s6 = inlined_call_operand.<no memory space> [shape: f32[1,1], index: 6, kind: input, shape index: {}]   ;;  %s250_s7 = inlined_call_operand.vmem [shape: f32[8,1], index: 7, kind: output, shape index: {}]  }
   0x1   :  { %v12_v0 = vstv %s249_s6 }
   0x2   :  { %13 = vst [vmem:[#allocation2] sm:$0x1] %v12_v0 }
   0x3   :  { %14 = vsyncpa [#allocation4], 0  ;;  %s25_s28 = sshll.u32 %s246_s3, 4  ;;  %s176_s29 = smov [#allocation3]   ;;  %s26_s28 = int_to_ptr.hbm [resolvable:$true] %s25_s28 }
   0x4   :  { %s27_s30 = sshll.u32 %s176_s29, 4  ;;  %s177_s8 = smov 128   ;;  %s28_s30 = int_to_ptr.vmem [resolvable:$true] %s27_s30 }
   0x5   :  { %s178_s9 = smov 8  }
   0x6   :  { %33 = dma.hbm_to_vmem [thread:$0]  %s26_s28, 1024, %s28_s30, [#allocation4], %s177_s8, %s177_s8, %s178_s9  }
   0x7   :  { %174 = dma.done.wait [#allocation4], 1024  }
   0x8   :  { %175 = vsyncadd [#allocation4], 4294966272  ;;  %vm54_vm0 = vcmask 1043456   ;;  %vm50_vm1 = vcmask 31744   ;;  %v45_v1 = vld [vmem:[%s244_s1] sm:$0xf] }
   0x9   :  { %v44_v2 = vld [vmem:[%s243_s0] sm:$0xff]  ;;  %136 = vmatpush.msk.msra.mxu0 %vm54_vm0, %v45_v1  ;;  %v85_v4 = vld [vmem:[#allocation3 + $0x30] sm:$0xff]  ;;  %v84_v5 = vld [vmem:[#allocation3 + $0x28] sm:$0xff]  ;;  %vm91_vm2 = vcmask 523264   ;;  %vm129_vm3 = vcmask 7168  }
   0xa   :  { %v86_v3 = vld [vmem:[#allocation3 + $0x38] sm:$0xff]  ;;  %137 = vmatmul.msk.f32.vlgmr.msra.gmra.mxu0 %vm50_vm1, %v44_v2  ;;  %v83_v6 = vld [vmem:[#allocation3 + $0x20] sm:$0xff]  ;;  %v81_v8 = vld [vmem:[#allocation3 + $0x10] sm:$0xff] }
   0xb   :  { %103 = vmatpush.msra.mxu1 %v86_v3  ;;  %v82_v7 = vld [vmem:[#allocation3 + $0x18] sm:$0xff]  ;;  %v80_v9 = vld [vmem:[#allocation3 + $0x8] sm:$0xff]  ;;  %v79_v10 = vld [vmem:[#allocation3] sm:$0xff] }
   0xc   :  { %v142_v11 = vld [vmem:[%s245_s2] ss:$0 sm:$0xff] }
   0xd   :  { %104 = vmatpush.msra.mxu1 %v85_v4  ;;  %v143_v15 = vld [vmem:[%s247_s4] ss:$0 sm:$0xff] }
   0xe   :  { %v144_v18 = vld [vmem:[%s248_s5] ss:$0 sm:$0xff] }
   0xf   :  { %105 = vmatpush.msra.mxu1 %v84_v5  ;;  %v145_v22 = vld [vmem:[#allocation2] ss:$0 sm:$0xff] }
  0x11   :  { %106 = vmatpush.msra.mxu1 %v83_v6 }
  0x13   :  { %107 = vmatpush.msra.mxu1 %v82_v7 }
  0x15   :  { %108 = vmatpush.msra.mxu1 %v81_v8 }
  0x17   :  { %109 = vmatpush.msra.mxu1 %v80_v9 }
  0x19   :  { %110 = vmatpush.msra.mxu1 %v79_v10 }
  0x87   :  { %v75_v12 = vpop.f32.mrf.mxu0 }
  0x88   :  { %v76_v13 = vadd.f32 %v142_v11, %v75_v12 }
  0x8a   :  { %146 = vtanh.f32 %v76_v13 }
  0x90   :  { %v147_v14 = vpop.eup %146 }
  0x91   :  { %138 = vmatmul.msk.f32.vlgmr.msra.gmra.mxu1 %vm91_vm2, %v147_v14 }
 0x10e   :  { %v112_v16 = vpop.f32.mrf.mxu1 }
 0x10f   :  { %v113_v17 = vadd.f32 %v143_v15, %v112_v16 }
 0x111   :  { %148 = vtanh.f32 %v113_v17 }
 0x117   :  { %v149_v19 = vpop.eup %148 }
 0x118   :  { %v120_v20 = vmul.f32 %v149_v19, %v144_v18 }
 0x11a   :  { %v121_v21 = vsel %vm91_vm2, %v120_v20, 0.0 }
 0x11b   :  { %122 = vadd.xlane.f32.xlu0 %v121_v21 }
 0x18e   :  { %v123_v23 = vpop.xlane.xlu0 %122 }
 0x18f   :  { %v128_v24 = vadd.f32 %v145_v22, %v123_v23 }
 0x191   :  { %130 = vst.msk [vmem:[%s250_s7] sm:$0xff] %vm129_vm3, %v128_v24 }
 0x192   :  { %135 = vsyncpa [#allocation4], 1 }

</bundles_post_ra>
